<compile_context>
chip_gen: v5e
topology: v5e:2x2
jax: 0.10.0
libtpu: 0.0.40
codegen_flags: <defaults>
</compile_context>

<pallas_src>
import jax
import jax.numpy as jnp
from jax import lax
from jax.experimental import pallas as pl
from jax.experimental.pallas import tpu as pltpu

HIDDEN = 1000  # hidden width of the reference module


def _round_up(x: int, m: int) -> int:
    return ((x + m - 1) // m) * m


def _cdiv(a: int, b: int) -> int:
    return -(-a // b)


def _netd_synth_kernel(x_ref, w1_ref, w2_ref, b2_ref, o_ref):
    """One batch tile.

    x_ref  : (TB, DPAD)   bf16  input tile, native (batch, feature) layout;
                                column DIMX holds the bias "ones", rest zero-pad
    w1_ref : (HPAD, DPAD) bf16  Linear(dimx,1000).weight with b1 folded into
                                column DIMX (VMEM-resident, constant index_map)
    w2_ref : (1, HPAD)    f32   Linear(1000,1).weight as a lane-dense row
    b2_ref : (1,)         f32   scalar bias in SMEM
    o_ref  : (1, TB)      f32   lane-dense output row (batch on lanes)
    """
    # Layer 1 (+ folded bias) on the MXU: contract the feature dim of both
    # operands -> (HPAD, TB), batch on lanes, f32 accumulation.
    h = lax.dot_general(
        w1_ref[...], x_ref[...],
        dimension_numbers=(((1,), (1,)), ((), ())),
        preferred_element_type=jnp.float32)
    # LeakyReLU(0.2), max-form (mul + max instead of cmp + mul + select).
    h = jnp.maximum(h, 0.2 * h)
    # Layer 2 (out_features == 1) on the MXU: (1, HPAD) @ (HPAD, TB) -> (1, TB).
    o = jnp.dot(w2_ref[...], h, preferred_element_type=jnp.float32)
    o_ref[...] = o + b2_ref[0]


def pack_params(w1, b1, w2, b2, dimx):
    """One-time parameter prep (native PyTorch layouts in, packed layouts out).

    W1 is zero-padded to (HPAD, DPAD) with b1 folded into column `dimx`, then
    cast to bf16.  w2 becomes a lane-dense (1, HPAD) f32 row; b2 stays a (1,)
    f32 scalar (lives in SMEM inside the kernel).
    """
    hidden = w1.shape[0]
    dpad = _round_up(dimx + 1, 128)     # +1 column for the folded bias -> 128
    hpad = _round_up(hidden, 128)       # 1000 -> 1024
    w1p = jnp.zeros((hpad, dpad), jnp.float32)
    w1p = w1p.at[:hidden, :dimx].set(w1)
    w1p = w1p.at[:hidden, dimx].set(b1)            # fold b1 (stored in bf16)
    w2p = jnp.zeros((1, hpad), jnp.float32).at[0, :hidden].set(w2.reshape(-1))
    b2p = jnp.asarray(b2, jnp.float32).reshape(1)
    return w1p.astype(jnp.bfloat16), w2p, b2p


def _choose_batch_tiling(B: int):
    """Pick (padded batch, lane-dense batch tile)."""
    b_pad = _round_up(B, 128)
    n128 = b_pad // 128
    if n128 <= 1:
        return b_pad, b_pad                  # single 128-lane tile
    # >= 2 tiles so v7x can split the "parallel" axis across its 2 TCs,
    # <= 1024 lanes/tile to amortize per-grid-step overhead while keeping the
    # (HPAD, tb) f32 intermediate <= 4 MiB (v5e scoped-VMEM safe).
    n_tiles = max(2, _cdiv(n128, 8))
    tb = _cdiv(n128, n_tiles) * 128
    return _round_up(b_pad, tb), tb


def netd_synth_forward(x, w1_bf16, w2_row, b2_vec):
    """x: (B, dimx) f32.  Returns (B,) f32  (== output.view(B, 1).squeeze(1))."""
    B, dimx = x.shape
    hpad, dpad = w1_bf16.shape
    assert dimx + 1 <= dpad

    b_pad, tb = _choose_batch_tiling(B)
    grid = (b_pad // tb,)

    # Single fused host op (NO transpose): pad batch/features, append the
    # bias "ones" column, cast to bf16.  Zero padding is numerically exact;
    # padded batch rows compute garbage that is sliced off below.
    xp = jnp.zeros((b_pad, dpad), jnp.bfloat16)
    xp = xp.at[:B, :dimx].set(x.astype(jnp.bfloat16))
    xp = xp.at[:B, dimx].set(jnp.ones((B,), jnp.bfloat16))

    flops = 2 * b_pad * dpad * hpad + 2 * b_pad * hpad + 2 * b_pad * hpad
    bytes_accessed = (w1_bf16.size * 2 + xp.size * 2 + w2_row.size * 4
                      + b2_vec.size * 4 + b_pad * 4)

    out = pl.pallas_call(
        _netd_synth_kernel,
        out_shape=jax.ShapeDtypeStruct((1, b_pad), jnp.float32),
        grid_spec=pltpu.PrefetchScalarGridSpec(
            num_scalar_prefetch=0,
            grid=grid,
            in_specs=[
                pl.BlockSpec((tb, dpad), lambda i: (i, 0)),    # x tile (streamed)
                pl.BlockSpec((hpad, dpad), lambda i: (0, 0)),  # W1 (VMEM-resident)
                pl.BlockSpec((1, hpad), lambda i: (0, 0)),     # w2 row (resident)
                pl.BlockSpec(memory_space=pltpu.MemorySpace.SMEM),  # b2 scalar
            ],
            out_specs=pl.BlockSpec((1, tb), lambda i: (0, i)),  # lane-dense out
        ),
        compiler_params=pltpu.CompilerParams(
            dimension_semantics=("parallel",),   # megacore-shardable on v7x
        ),
        cost_estimate=pl.CostEstimate(
            flops=flops, transcendentals=0, bytes_accessed=bytes_accessed),
    )(xp, w1_bf16, w2_row, b2_vec)

    # output.view(B, num_classes).squeeze(1) with num_classes == 1.
    return out[0, :B]


def init_params(key, dimx=100, hidden=HIDDEN):
    """Deterministic PyTorch nn.Linear-style init (native PyTorch layouts)."""
    k1, k2, k3, k4 = jax.random.split(key, 4)
    bound1 = 1.0 / (dimx ** 0.5)
    w1 = jax.random.uniform(k1, (hidden, dimx), jnp.float32, -bound1, bound1)
    b1 = jax.random.uniform(k2, (hidden,), jnp.float32, -bound1, bound1)
    bound2 = 1.0 / (hidden ** 0.5)
    w2 = jax.random.uniform(k3, (1, hidden), jnp.float32, -bound2, bound2)
    b2 = jax.random.uniform(k4, (1,), jnp.float32, -bound2, bound2)
    return w1, b1, w2, b2


if __name__ == "__main__":
    B, DIMX = 8, 100
    key = jax.random.PRNGKey(0)
    kx, kp = jax.random.split(key)

    x = jax.random.normal(kx, (B, DIMX), jnp.float32)
    w1, b1, w2, b2 = init_params(kp, dimx=DIMX, hidden=HIDDEN)
    w1_bf16, w2_row, b2_vec = pack_params(w1, b1, w2, b2, DIMX)

    fwd = jax.jit(netd_synth_forward)
    out = jax.block_until_ready(fwd(x, w1_bf16, w2_row, b2_vec))
    assert out.shape == (B,) and out.dtype == jnp.float32

    # Reference 1: same bf16 first-layer operands (incl. bf16-folded b1),
    # f32 accumulation (tight tolerance).
    xb = jnp.concatenate([x, jnp.ones((B, 1), x.dtype)], axis=1).astype(jnp.bfloat16)
    w1b = w1_bf16[:HIDDEN, :DIMX + 1]
    h_ref = jnp.dot(xb, w1b.T, preferred_element_type=jnp.float32)
    h_ref = jnp.maximum(h_ref, 0.2 * h_ref)
    ref_bf16 = (h_ref @ w2.T + b2).reshape(B)
    assert jnp.allclose(out, ref_bf16, atol=2e-3, rtol=2e-3), (
        float(jnp.max(jnp.abs(out - ref_bf16))))

    # Reference 2: full-f32 module semantics (looser tol covers bf16 weights).
    h32 = x @ w1.T + b1
    h32 = jnp.where(h32 > 0, h32, 0.2 * h32)
    ref_f32 = (h32 @ w2.T + b2).reshape(B)
    assert jnp.allclose(out, ref_f32, atol=5e-2, rtol=5e-2), (
        float(jnp.max(jnp.abs(out - ref_f32))))

    print("KERNEL_OK")
</pallas_src>

<mosaic_0001>
module attributes {stable_mosaic.version = 11 : i64} {
  func.func @_netd_synth_kernel(%arg0: i32, %arg1: memref<128x128xbf16, #tpu.memory_space<vmem>>, %arg2: memref<1024x128xbf16, #tpu.memory_space<vmem>>, %arg3: memref<1x1024xf32, #tpu.memory_space<vmem>>, %arg4: memref<1xf32, #tpu.memory_space<smem>>, %arg5: memref<1x128xf32, #tpu.memory_space<vmem>>) attributes {dimension_semantics = [#tpu.dimension_semantics<parallel>], iteration_bounds = array<i64: 1>, scalar_prefetch = 0 : i64, scratch_operands = 0 : i64, tpu.core_type = #tpu.core_type<tc>, window_params = [{transform_indices = @transform_0, window_bounds = array<i64: 128, 128>}, {pipeline_mode = #tpu.pipeline_mode<synchronous>, transform_indices = @transform_1, window_bounds = array<i64: 1024, 128>}, {pipeline_mode = #tpu.pipeline_mode<synchronous>, transform_indices = @transform_2, window_bounds = array<i64: 1, 1024>}, {transform_indices = @transform_3, window_bounds = array<i64: 1>}, {transform_indices = @transform_4, window_bounds = array<i64: 1, 128>}]} {
    %c0 = arith.constant 0 : index
    %c0_0 = arith.constant 0 : index
    %0 = vector.load %arg2[%c0, %c0_0] : memref<1024x128xbf16, #tpu.memory_space<vmem>>, vector<1024x128xbf16>
    %c0_1 = arith.constant 0 : index
    %c0_2 = arith.constant 0 : index
    %1 = vector.load %arg1[%c0_1, %c0_2] : memref<128x128xbf16, #tpu.memory_space<vmem>>, vector<128x128xbf16>
    %cst = arith.constant dense<0.000000e+00> : vector<1024x128xf32>
    %2 = tpu.matmul %0, %1, %cst {dimension_numbers = #tpu.dot_dimension_numbers<[1], [1], [0], [0], [0, 0, 1, 0], [], []>} : vector<1024x128xbf16>, vector<128x128xbf16>, vector<1024x128xf32> -> vector<1024x128xf32>
    %cst_3 = arith.constant 2.000000e-01 : f32
    %3 = vector.broadcast %cst_3 : f32 to vector<1024x128xf32>
    %4 = arith.mulf %3, %2 : vector<1024x128xf32>
    %5 = arith.maximumf %2, %4 : vector<1024x128xf32>
    %c0_4 = arith.constant 0 : index
    %c0_5 = arith.constant 0 : index
    %6 = vector.load %arg3[%c0_4, %c0_5] : memref<1x1024xf32, #tpu.memory_space<vmem>>, vector<1x1024xf32>
    %cst_6 = arith.constant dense<0.000000e+00> : vector<1x128xf32>
    %7 = tpu.matmul %6, %5, %cst_6 {dimension_numbers = #tpu.dot_dimension_numbers<[1], [0], [0], [1], [0, 0, 1, 1], [], []>} : vector<1x1024xf32>, vector<1024x128xf32>, vector<1x128xf32> -> vector<1x128xf32>
    %c0_7 = arith.constant 0 : index
    %8 = memref.load %arg4[%c0_7] : memref<1xf32, #tpu.memory_space<smem>>
    %9 = vector.broadcast %8 : f32 to vector<1x128xf32>
    %10 = arith.addf %7, %9 : vector<1x128xf32>
    %c0_8 = arith.constant 0 : index
    %c0_9 = arith.constant 0 : index
    %11 = vector.load %arg5[%c0_8, %c0_9] : memref<1x128xf32, #tpu.memory_space<vmem>>, vector<1x128xf32>
    tpu.vector_store %arg5[%c0_8, %c0_9], %10 {strides = array<i32>} : memref<1x128xf32, #tpu.memory_space<vmem>>, vector<1x128xf32>,
    return
  }
  func.func @transform_0(%arg0: i32) -> (i32, i32) {
    %c0_i32 = arith.constant 0 : i32
    %c0_i32_0 = arith.constant 0 : i32
    return %arg0, %c0_i32 : i32, i32
  }
  func.func @transform_1(%arg0: i32) -> (i32, i32) {
    %c0_i32 = arith.constant 0 : i32
    %c0_i32_0 = arith.constant 0 : i32
    %c0_i32_1 = arith.constant 0 : i32
    return %c0_i32, %c0_i32_0 : i32, i32
  }
  func.func @transform_2(%arg0: i32) -> (i32, i32) {
    %c0_i32 = arith.constant 0 : i32
    %c0_i32_0 = arith.constant 0 : i32
    %c0_i32_1 = arith.constant 0 : i32
    return %c0_i32, %c0_i32_0 : i32, i32
  }
  func.func @transform_3(%arg0: i32) -> i32 {
    %c0_i32 = arith.constant 0 : i32
    %c0_i32_0 = arith.constant 0 : i32
    return %c0_i32 : i32
  }
  func.func @transform_4(%arg0: i32) -> (i32, i32) {
    %c0_i32 = arith.constant 0 : i32
    %c0_i32_0 = arith.constant 0 : i32
    return %c0_i32, %arg0 : i32, i32
  }
}

</mosaic_0001>

<bundles_post_ra>
// kernel: netd_synth_forward.1
= control target key start
LH: loop header
LB: loop body
LE: loop exit
PB: predicated region body
PF: predicated region fallthrough
CT: control target
= control target key end

     0   :  { %10 = vsyncpa [#allocation4], 0  ;;  %s1794_s18 = smov [#allocation3]   ;;  %s1795_s20 = smov 64   ;;  %s2284_s0 = inlined_call_operand.vmem [shape: bf16[128,128], index: 0, kind: input, shape index: {}]   ;;  %s2285_s1 = inlined_call_operand.hbm [shape: bf16[1024,128], index: 1, kind: input, shape index: {}]   ;;  %s2286_s2 = inlined_call_operand.vmem [shape: f32[1,1024], index: 2, kind: input, shape index: {}]   ;;  %s2287_s3 = inlined_call_operand.<no memory space> [shape: f32[1], index: 3, kind: input, shape index: {}]   ;;  %s2288_s4 = inlined_call_operand.vmem [shape: f32[1,128], index: 4, kind: output, shape index: {}]  }
   0x1   :  { %s17_s17 = sshll.u32 %s2285_s1, 4  ;;  %s19_s19 = sshll.u32 %s1794_s18, 4  ;;  %s18_s17 = int_to_ptr.hbm [resolvable:$true] %s17_s17  ;;  %s20_s19 = int_to_ptr.vmem [resolvable:$true] %s19_s19 }
   0x2   :  { %s1796_s21 = smov 4  }
   0x3   :  { %25 = dma.hbm_to_vmem [thread:$0]  %s18_s17, 8192, %s20_s19, [#allocation4], %s1795_s20, %s1795_s20, %s1796_s21  }
   0x4   :  { %1792 = dma.done.wait [#allocation4], 8192  }
   0x5   :  { %1793 = vsyncadd [#allocation4], 4294959104  ;;  %v1740_v0 = vld [vmem:[%s2284_s0 + $0x38] sm:$0xff]  ;;  %v1739_v1 = vld [vmem:[%s2284_s0 + $0x30] sm:$0xff] }
   0x6   :  { %610 = vmatpush.bf16.xpose.msra.mxu0 %v1740_v0  ;;  %1741 = vmatpush.bf16.xpose.msra.mxu1 %v1740_v0  ;;  %v1738_v2 = vld [vmem:[%s2284_s0 + $0x28] sm:$0xff]  ;;  %v1737_v3 = vld [vmem:[%s2284_s0 + $0x20] sm:$0xff]  ;;  %v1736_v4 = vld [vmem:[%s2284_s0 + $0x18] sm:$0xff] }
   0x7   :  { %1743 = vmatpush.bf16.xpose.msra.mxu3 %v1740_v0  ;;  %1742 = vmatpush.bf16.xpose.msra.mxu2 %v1740_v0  ;;  %v1735_v5 = vld [vmem:[%s2284_s0 + $0x10] sm:$0xff]  ;;  %v1734_v6 = vld [vmem:[%s2284_s0 + $0x8] sm:$0xff]  ;;  %v1733_v7 = vld [vmem:[%s2284_s0] sm:$0xff] }
   0x8   :  { %v1669_v8 = vld [vmem:[#allocation3] sm:$0xff]  ;;  %v1687_v9 = vld [vmem:[#allocation3 + $0x90] sm:$0xff]  ;;  %v1670_v10 = vld [vmem:[#allocation3 + $0x8] sm:$0xff] }
   0x9   :  { %v1688_v11 = vld [vmem:[#allocation3 + $0x98] sm:$0xff]  ;;  %v1717_v12 = vld [vmem:[#allocation3 + $0x180] sm:$0xff]  ;;  %v1702_v13 = vld [vmem:[#allocation3 + $0x108] sm:$0xff] }
   0xa   :  { %v1671_v14 = vld [vmem:[#allocation3 + $0x10] sm:$0xff]  ;;  %v1689_v15 = vld [vmem:[#allocation3 + $0xa0] sm:$0xff]  ;;  %v1718_v16 = vld [vmem:[#allocation3 + $0x188] sm:$0xff] }
   0xb   :  { %v1703_v17 = vld [vmem:[#allocation3 + $0x110] sm:$0xff]  ;;  %v1672_v18 = vld [vmem:[#allocation3 + $0x18] sm:$0xff]  ;;  %v1690_v19 = vld [vmem:[#allocation3 + $0xa8] sm:$0xff] }
   0xc   :  { %v1719_v20 = vld [vmem:[#allocation3 + $0x190] sm:$0xff]  ;;  %v1704_v21 = vld [vmem:[#allocation3 + $0x118] sm:$0xff]  ;;  %v1673_v22 = vld [vmem:[#allocation3 + $0x20] sm:$0xff] }
   0xd   :  { %v1691_v23 = vld [vmem:[#allocation3 + $0xb0] sm:$0xff]  ;;  %v1720_v24 = vld [vmem:[#allocation3 + $0x198] sm:$0xff]  ;;  %v1705_v25 = vld [vmem:[#allocation3 + $0x120] sm:$0xff] }
   0xe   :  { %611 = vmatpush.bf16.xpose.msra.mxu0 %v1739_v1  ;;  %1744 = vmatpush.bf16.xpose.msra.mxu1 %v1739_v1  ;;  %v1674_v26 = vld [vmem:[#allocation3 + $0x28] sm:$0xff]  ;;  %v1692_v27 = vld [vmem:[#allocation3 + $0xb8] sm:$0xff]  ;;  %v1721_v28 = vld [vmem:[#allocation3 + $0x1a0] sm:$0xff] }
   0xf   :  { %1746 = vmatpush.bf16.xpose.msra.mxu3 %v1739_v1  ;;  %1745 = vmatpush.bf16.xpose.msra.mxu2 %v1739_v1  ;;  %v1706_v29 = vld [vmem:[#allocation3 + $0x128] sm:$0xff]  ;;  %v1675_v30 = vld [vmem:[#allocation3 + $0x30] sm:$0xff]  ;;  %v1693_v31 = vld [vmem:[#allocation3 + $0xc0] sm:$0xff] }
  0x10   :  { %v1722_v32 = vld [vmem:[#allocation3 + $0x1a8] sm:$0xff]  ;;  %v1707_v33 = vld [vmem:[#allocation3 + $0x130] sm:$0xff]  ;;  %v1676_v34 = vld [vmem:[#allocation3 + $0x38] sm:$0xff] }
  0x11   :  { %v1694_v35 = vld [vmem:[#allocation3 + $0xc8] sm:$0xff]  ;;  %v1723_v36 = vld [vmem:[#allocation3 + $0x1b0] sm:$0xff]  ;;  %v1708_v37 = vld [vmem:[#allocation3 + $0x138] sm:$0xff] }
  0x12   :  { %v1677_v38 = vld [vmem:[#allocation3 + $0x40] sm:$0xff]  ;;  %v1695_v39 = vld [vmem:[#allocation3 + $0xd0] sm:$0xff]  ;;  %v1724_v40 = vld [vmem:[#allocation3 + $0x1b8] sm:$0xff] }
  0x13   :  { %v1709_v43 = vld [vmem:[#allocation3 + $0x140] sm:$0xff]  ;;  %v1678_v46 = vld [vmem:[#allocation3 + $0x48] sm:$0xff]  ;;  %v1696_v47 = vld [vmem:[#allocation3 + $0xd8] sm:$0xff] }
  0x14   :  { %v1725_v48 = vld [vmem:[#allocation3 + $0x1c0] sm:$0xff]  ;;  %v1710_v51 = vld [vmem:[#allocation3 + $0x148] sm:$0xff]  ;;  %v1679_v57 = vld [vmem:[#allocation3 + $0x50] sm:$0xff] }
  0x15   :  { %v1697_v58 = vld [vmem:[#allocation3 + $0xe0] sm:$0xff]  ;;  %v1726_v59 = vld [vmem:[#allocation3 + $0x1c8] sm:$0xff]  ;;  %v1711_v63 = vld [vmem:[#allocation3 + $0x150] sm:$0xff] }
  0x16   :  { %612 = vmatpush.bf16.xpose.msra.mxu0 %v1738_v2  ;;  %1747 = vmatpush.bf16.xpose.msra.mxu1 %v1738_v2 }
  0x17   :  { %1749 = vmatpush.bf16.xpose.msra.mxu3 %v1738_v2  ;;  %1748 = vmatpush.bf16.xpose.msra.mxu2 %v1738_v2 }
  0x1e   :  { %613 = vmatpush.bf16.xpose.msra.mxu0 %v1737_v3  ;;  %1750 = vmatpush.bf16.xpose.msra.mxu1 %v1737_v3 }
  0x1f   :  { %1752 = vmatpush.bf16.xpose.msra.mxu3 %v1737_v3  ;;  %1751 = vmatpush.bf16.xpose.msra.mxu2 %v1737_v3 }
  0x26   :  { %614 = vmatpush.bf16.xpose.msra.mxu0 %v1736_v4  ;;  %1753 = vmatpush.bf16.xpose.msra.mxu1 %v1736_v4 }
  0x27   :  { %1755 = vmatpush.bf16.xpose.msra.mxu3 %v1736_v4  ;;  %1754 = vmatpush.bf16.xpose.msra.mxu2 %v1736_v4 }
  0x2e   :  { %615 = vmatpush.bf16.xpose.msra.mxu0 %v1735_v5  ;;  %1756 = vmatpush.bf16.xpose.msra.mxu1 %v1735_v5 }
  0x2f   :  { %1758 = vmatpush.bf16.xpose.msra.mxu3 %v1735_v5  ;;  %1757 = vmatpush.bf16.xpose.msra.mxu2 %v1735_v5  ;;  %v1680_v5 = vld [vmem:[#allocation3 + $0x58] sm:$0xff] }
  0x36   :  { %616 = vmatpush.bf16.xpose.msra.mxu0 %v1734_v6  ;;  %1759 = vmatpush.bf16.xpose.msra.mxu1 %v1734_v6 }
  0x37   :  { %1761 = vmatpush.bf16.xpose.msra.mxu3 %v1734_v6  ;;  %1760 = vmatpush.bf16.xpose.msra.mxu2 %v1734_v6  ;;  %v1698_v6 = vld [vmem:[#allocation3 + $0xe8] sm:$0xff] }
  0x3e   :  { %617 = vmatpush.bf16.xpose.msra.mxu0 %v1733_v7  ;;  %1762 = vmatpush.bf16.xpose.msra.mxu1 %v1733_v7 }
  0x3f   :  { %1764 = vmatpush.bf16.xpose.msra.mxu3 %v1733_v7  ;;  %1763 = vmatpush.bf16.xpose.msra.mxu2 %v1733_v7  ;;  %v1727_v7 = vld [vmem:[#allocation3 + $0x1d0] sm:$0xff] }
  0x45   :  { %618 = vmatmul.bf16.vlgmr.msra.gmra.mxu0 %v1669_v8  ;;  %708 = vmatmul.bf16.vlgmr.msra.gmra.mxu1 %v1687_v9 }
  0x46   :  { %858 = vmatmul.bf16.vlgmr.msra.gmra.mxu3 %v1717_v12  ;;  %783 = vmatmul.bf16.vlgmr.msra.gmra.mxu2 %v1702_v13 }
  0x55   :  { %623 = vmatmul.bf16.gmra.mxu0 %v1670_v10  ;;  %713 = vmatmul.bf16.gmra.mxu1 %v1688_v11  ;;  %v1712_v11 = vld [vmem:[#allocation3 + $0x158] sm:$0xff] }
  0x56   :  { %863 = vmatmul.bf16.gmra.mxu3 %v1718_v16  ;;  %788 = vmatmul.bf16.gmra.mxu2 %v1703_v17  ;;  %v1681_v17 = vld [vmem:[#allocation3 + $0x60] sm:$0xff] }
  0x65   :  { %628 = vmatmul.bf16.gmra.mxu0 %v1671_v14  ;;  %718 = vmatmul.bf16.gmra.mxu1 %v1689_v15 }
  0x66   :  { %868 = vmatmul.bf16.gmra.mxu3 %v1719_v20  ;;  %793 = vmatmul.bf16.gmra.mxu2 %v1704_v21 }
  0x75   :  { %633 = vmatmul.bf16.gmra.mxu0 %v1672_v18  ;;  %723 = vmatmul.bf16.gmra.mxu1 %v1690_v19  ;;  %v1699_v18 = vld [vmem:[#allocation3 + $0xf0] sm:$0xff]  ;;  %v1728_v19 = vld [vmem:[#allocation3 + $0x1d8] sm:$0xff] }
  0x76   :  { %873 = vmatmul.bf16.gmra.mxu3 %v1720_v24  ;;  %798 = vmatmul.bf16.gmra.mxu2 %v1705_v25 }
  0x85   :  { %638 = vmatmul.bf16.gmra.mxu0 %v1673_v22  ;;  %728 = vmatmul.bf16.gmra.mxu1 %v1691_v23  ;;  %v1713_v23 = vld [vmem:[#allocation3 + $0x160] sm:$0xff] }
  0x86   :  { %878 = vmatmul.bf16.gmra.mxu3 %v1721_v28  ;;  %803 = vmatmul.bf16.gmra.mxu2 %v1706_v29  ;;  %v1682_v29 = vld [vmem:[#allocation3 + $0x68] sm:$0xff] }
  0x95   :  { %643 = vmatmul.bf16.gmra.mxu0 %v1674_v26  ;;  %733 = vmatmul.bf16.gmra.mxu1 %v1692_v27 }
  0x96   :  { %883 = vmatmul.bf16.gmra.mxu3 %v1722_v32  ;;  %808 = vmatmul.bf16.gmra.mxu2 %v1707_v33 }
  0xa5   :  { %648 = vmatmul.bf16.gmra.mxu0 %v1675_v30  ;;  %738 = vmatmul.bf16.gmra.mxu1 %v1693_v31  ;;  %v1700_v30 = vld [vmem:[#allocation3 + $0xf8] sm:$0xff]  ;;  %v1729_v31 = vld [vmem:[#allocation3 + $0x1e0] sm:$0xff] }
  0xa6   :  { %888 = vmatmul.bf16.gmra.mxu3 %v1723_v36  ;;  %813 = vmatmul.bf16.gmra.mxu2 %v1708_v37 }
  0xb5   :  { %653 = vmatmul.bf16.gmra.mxu0 %v1676_v34  ;;  %743 = vmatmul.bf16.gmra.mxu1 %v1694_v35  ;;  %v1714_v35 = vld [vmem:[#allocation3 + $0x168] sm:$0xff] }
  0xb6   :  { %893 = vmatmul.bf16.gmra.mxu3 %v1724_v40  ;;  %818 = vmatmul.bf16.gmra.mxu2 %v1709_v43 }
  0xc2   :  { %v1849_v41 = vpop.f32.mrf.mxu0  ;;  %v1851_v42 = vpop.f32.mrf.mxu1 }
  0xc5   :  { %658 = vmatmul.bf16.gmra.mxu0 %v1677_v38  ;;  %748 = vmatmul.bf16.gmra.mxu1 %v1695_v39 }
  0xc6   :  { %898 = vmatmul.bf16.gmra.mxu3 %v1725_v48  ;;  %823 = vmatmul.bf16.gmra.mxu2 %v1710_v51 }
  0xc9   :  { %v1861_v52 = vpop.f32.mrf.mxu3  ;;  %v1863_v53 = vpop.f32.mrf.mxu2 }
  0xca   :  { %v1853_v44 = vpop.f32.mrf.mxu0  ;;  %v1855_v45 = vpop.f32.mrf.mxu1  ;;  %2316 = vst [vmem:[#allocation6_spill] sm:$0xff] %v1863_v53 }
  0xd1   :  { %v1869_v56 = vpop.f32.mrf.mxu3  ;;  %v1871_v60 = vpop.f32.mrf.mxu2 }
  0xd2   :  { %v1857_v49 = vpop.f32.mrf.mxu0  ;;  %v1859_v50 = vpop.f32.mrf.mxu1  ;;  %2317 = vst [vmem:[#allocation7_spill] sm:$0xff] %v1871_v60 }
  0xd5   :  { %663 = vmatmul.bf16.gmra.mxu0 %v1678_v46  ;;  %753 = vmatmul.bf16.gmra.mxu1 %v1696_v47 }
  0xd6   :  { %903 = vmatmul.bf16.gmra.mxu3 %v1726_v59  ;;  %828 = vmatmul.bf16.gmra.mxu2 %v1711_v63  ;;  %v1683_v63 = vld [vmem:[#allocation3 + $0x70] sm:$0xff] }
  0xd9   :  { %v1877_v0 = vpop.f32.mrf.mxu3  ;;  %v1879_v1 = vpop.f32.mrf.mxu2 }
  0xda   :  { %v1865_v54 = vpop.f32.mrf.mxu0  ;;  %v1867_v55 = vpop.f32.mrf.mxu1  ;;  %2318 = vst [vmem:[#allocation8_spill] sm:$0xff] %v1879_v1 }
  0xe1   :  { %v1885_v4 = vpop.f32.mrf.mxu3  ;;  %v1887_v8 = vpop.f32.mrf.mxu2 }
  0xe2   :  { %v1873_v61 = vpop.f32.mrf.mxu0  ;;  %v1875_v62 = vpop.f32.mrf.mxu1  ;;  %2319 = vst [vmem:[#allocation9_spill] sm:$0xff] %v1887_v8 }
  0xe5   :  { %668 = vmatmul.bf16.gmra.mxu0 %v1679_v57  ;;  %758 = vmatmul.bf16.gmra.mxu1 %v1697_v58 }
  0xe6   :  { %908 = vmatmul.bf16.gmra.mxu3 %v1727_v7  ;;  %833 = vmatmul.bf16.gmra.mxu2 %v1712_v11  ;;  %v1730_v7 = vld [vmem:[#allocation3 + $0x1e8] sm:$0xff] }
  0xe9   :  { %v1893_v12 = vpop.f32.mrf.mxu3  ;;  %v1895_v13 = vpop.f32.mrf.mxu2 }
  0xea   :  { %v1881_v2 = vpop.f32.mrf.mxu0  ;;  %v1883_v3 = vpop.f32.mrf.mxu1  ;;  %2320 = vst [vmem:[#allocation10_spill] sm:$0xff] %v1895_v13 }
  0xf1   :  { %v1899_v16 = vpop.f32.mrf.mxu3  ;;  %v1901_v20 = vpop.f32.mrf.mxu2 }
  0xf2   :  { %v1889_v9 = vpop.f32.mrf.mxu0  ;;  %v1891_v10 = vpop.f32.mrf.mxu1  ;;  %2321 = vst [vmem:[#allocation11_spill] sm:$0xff] %v1901_v20 }
  0xf5   :  { %673 = vmatmul.bf16.gmra.mxu0 %v1680_v5  ;;  %763 = vmatmul.bf16.gmra.mxu1 %v1698_v6  ;;  %v981_v6 = vmul.f32 0.2, %v1891_v10 }
  0xf6   :  { %913 = vmatmul.bf16.gmra.mxu3 %v1728_v19  ;;  %838 = vmatmul.bf16.gmra.mxu2 %v1713_v23 }
  0xf7   :  { %v1109_v23 = vmax.f32 %v1891_v10, %v981_v6  ;;  %v1716_v6 = vld [vmem:[#allocation3 + $0x178] sm:$0xff] }
  0xf9   :  { %v1905_v24 = vpop.f32.mrf.mxu3  ;;  %v1907_v25 = vpop.f32.mrf.mxu2 }
  0xfa   :  { %v1897_v14 = vpop.f32.mrf.mxu0  ;;  %v726_v15 = vpop.f32.mrf.mxu1  ;;  %2322 = vst [vmem:[#allocation12_spill] sm:$0xff] %v1907_v25 }
  0xfb   :  { %v982_v59 = vmul.f32 0.2, %v726_v15 }
  0xfd   :  { %v1110_v19 = vmax.f32 %v726_v15, %v982_v59 }
 0x101   :  { %v1911_v28 = vpop.f32.mrf.mxu3  ;;  %v1913_v32 = vpop.f32.mrf.mxu2 }
 0x102   :  { %v1903_v21 = vpop.f32.mrf.mxu0  ;;  %v729_v22 = vpop.f32.mrf.mxu1  ;;  %2323 = vst [vmem:[#allocation13_spill] sm:$0xff] %v1913_v32 }
 0x103   :  { %v983_v47 = vmul.f32 0.2, %v729_v22 }
 0x105   :  { %678 = vmatmul.bf16.gmra.mxu0 %v1681_v17  ;;  %768 = vmatmul.bf16.gmra.mxu1 %v1699_v18  ;;  %v1111_v5 = vmax.f32 %v729_v22, %v983_v47  ;;  %v975_v47 = vmul.f32 0.2, %v1851_v42 }
 0x106   :  { %918 = vmatmul.bf16.gmra.mxu3 %v1729_v31  ;;  %843 = vmatmul.bf16.gmra.mxu2 %v1714_v35 }
 0x109   :  { %v1917_v36 = vpop.f32.mrf.mxu3  ;;  %v1919_v38 = vpop.f32.mrf.mxu2 }
 0x10a   :  { %v1909_v26 = vpop.f32.mrf.mxu0  ;;  %v731_v27 = vpop.f32.mrf.mxu1  ;;  %2324 = vst [vmem:[#allocation14_spill] sm:$0xff] %v1919_v38 }
 0x10b   :  { %v984_v43 = vmul.f32 0.2, %v731_v27 }
 0x10d   :  { %v1112_v58 = vmax.f32 %v731_v27, %v984_v43  ;;  %v980_v27 = vmul.f32 0.2, %v1883_v3 }
 0x10f   :  { %v1108_v31 = vmax.f32 %v1883_v3, %v980_v27 }
 0x111   :  { %v1923_v57 = vpop.f32.mrf.mxu3  ;;  %v1926_v11 = vpop.f32.mrf.mxu2 }
 0x112   :  { %v1915_v33 = vpop.f32.mrf.mxu0  ;;  %v734_v34 = vpop.f32.mrf.mxu1  ;;  %2325 = vst [vmem:[#allocation15_spill] sm:$0xff] %v1926_v11 }
 0x113   :  { %v985_v37 = vmul.f32 0.2, %v734_v34 }
 0x115   :  { %683 = vmatmul.bf16.gmra.mxu0 %v1682_v29  ;;  %773 = vmatmul.bf16.gmra.mxu1 %v1700_v30  ;;  %v1113_v51 = vmax.f32 %v734_v34, %v985_v37  ;;  %v1715_v29 = vld [vmem:[#allocation3 + $0x170] sm:$0xff]  ;;  %v979_v30 = vmul.f32 0.2, %v1875_v62  ;;  %v978_v34 = vmul.f32 0.2, %v1867_v55 }
 0x116   :  { %923 = vmatmul.bf16.gmra.mxu3 %v1730_v7  ;;  %848 = vmatmul.bf16.gmra.mxu2 %v1715_v29  ;;  %v977_v37 = vmul.f32 0.2, %v1859_v50 }
 0x117   :  { %v1107_v10 = vmax.f32 %v1875_v62, %v979_v30  ;;  %v1106_v43 = vmax.f32 %v1867_v55, %v978_v34  ;;  %v1103_v55 = vmax.f32 %v1851_v42, %v975_v47  ;;  %v1685_v47 = vld [vmem:[#allocation3 + $0x80] sm:$0xff] }
 0x118   :  { %v1105_v3 = vmax.f32 %v1859_v50, %v977_v37 }
 0x119   :  { %v1934_v22 = vpop.f32.mrf.mxu3 }
 0x11a   :  { %v1921_v39 = vpop.f32.mrf.mxu0  ;;  %v736_v40 = vpop.f32.mrf.mxu1 }
 0x11b   :  { %v986_v46 = vmul.f32 0.2, %v736_v40 }
 0x11d   :  { %v1114_v48 = vmax.f32 %v736_v40, %v986_v46  ;;  %v1943_v40 = vpop.f32.mrf.mxu2  ;;  %v976_v46 = vmul.f32 0.2, %v1855_v45 }
 0x11e   :  { %2326 = vst [vmem:[#allocation16_spill] sm:$0xff] %v1943_v40 }
 0x11f   :  { %1255 = vmatpush.msrb.mxu3 %v1114_v48 }
 0x121   :  { %1256 = vmatpush.msrb.mxu3 %v1113_v51  ;;  %v1949_v48 = vpop.f32.mrf.mxu3  ;;  %v1104_v51 = vmax.f32 %v1855_v45, %v976_v46 }
 0x122   :  { %v1928_v17 = vpop.f32.mrf.mxu0  ;;  %v1930_v18 = vpop.f32.mrf.mxu1 }
 0x123   :  { %1257 = vmatpush.msrb.mxu3 %v1112_v58  ;;  %v1684_v58 = vld [vmem:[#allocation3 + $0x78] sm:$0xff] }
 0x125   :  { %688 = vmatmul.bf16.gmra.mxu0 %v1683_v63  ;;  %1258 = vmatpush.msrb.mxu3 %v1111_v5  ;;  %v1731_v63 = vld [vmem:[#allocation3 + $0x1f0] sm:$0xff]  ;;  %v1955_v5 = vpop.f32.mrf.mxu2 }
 0x126   :  { %928 = vmatmul.bf16.gmra.mxu3 %v1731_v63  ;;  %853 = vmatmul.bf16.gmra.mxu2 %v1716_v6  ;;  %v947_v6 = vmul.f32 0.2, %v1903_v21 }
 0x127   :  { %1259 = vmatpush.msrb.mxu3 %v1110_v19 }
 0x129   :  { %1260 = vmatpush.msrb.mxu3 %v1109_v23  ;;  %v1957_v50 = vpop.f32.mrf.mxu3 }
 0x12a   :  { %v651_v15 = vpop.f32.mrf.mxu0  ;;  %v1939_v35 = vpop.f32.mrf.mxu1 }
 0x12b   :  { %1261 = vmatpush.msrb.mxu3 %v1108_v31  ;;  %v952_v29 = vmul.f32 0.2, %v651_v15  ;;  %v951_v31 = vmul.f32 0.2, %v1928_v17 }
 0x12d   :  { %1262 = vmatpush.msrb.mxu3 %v1107_v10  ;;  %v1961_v27 = vpop.f32.mrf.mxu2  ;;  %v1080_v37 = vmax.f32 %v651_v15, %v952_v29  ;;  %v950_v10 = vmul.f32 0.2, %v1921_v39  ;;  %v948_v15 = vmul.f32 0.2, %v1909_v26 }
 0x12f   :  { %1263 = vmatpush.msrb.mxu3 %v1106_v43  ;;  %v1078_v63 = vmax.f32 %v1921_v39, %v950_v10 }
 0x131   :  { %1264 = vmatpush.msrb.mxu3 %v1105_v3  ;;  %v1964_v34 = vpop.f32.mrf.mxu3  ;;  %v1732_v3 = vld [vmem:[#allocation3 + $0x1f8] sm:$0xff] }
 0x132   :  { %v654_v59 = vpop.f32.mrf.mxu0  ;;  %v1952_v62 = vpop.f32.mrf.mxu1 }
 0x133   :  { %1265 = vmatpush.msrb.mxu3 %v1104_v51  ;;  %v953_v45 = vmul.f32 0.2, %v654_v59  ;;  %v949_v51 = vmul.f32 0.2, %v1915_v33 }
 0x135   :  { %693 = vmatmul.bf16.gmra.mxu0 %v1684_v58  ;;  %1266 = vmatpush.msrb.mxu3 %v1103_v55  ;;  %v1081_v42 = vmax.f32 %v654_v59, %v953_v45  ;;  %v1079_v58 = vmax.f32 %v1928_v17, %v951_v31  ;;  %v1973_v59 = vpop.f32.mrf.mxu2  ;;  %v1701_v55 = vld [vmem:[#allocation3 + $0x100] sm:$0xff]  ;;  %v1076_v45 = vmax.f32 %v1909_v26, %v948_v15  ;;  %v946_v17 = vmul.f32 0.2, %v1897_v14 }
 0x136   :  { %933 = vmatmul.bf16.gmra.mxu3 %v1732_v3  ;;  %778 = vmatmul.bf16.gmra.mxu1 %v1701_v55  ;;  %v944_v26 = vmul.f32 0.2, %v1881_v2  ;;  %v942_v3 = vmul.f32 0.2, %v1865_v54 }
 0x13a   :  { %v656_v7 = vpop.f32.mrf.mxu0  ;;  %v1959_v19 = vpop.f32.mrf.mxu1 }
 0x13b   :  { %v954_v23 = vmul.f32 0.2, %v656_v7 }
 0x13d   :  { %v1082_v30 = vmax.f32 %v656_v7, %v954_v23  ;;  %v1077_v7 = vmax.f32 %v1915_v33, %v949_v51  ;;  %v1981_v23 = vpop.f32.mrf.mxu3  ;;  %v1989_v31 = vpop.f32.mrf.mxu2  ;;  %v1074_v33 = vmax.f32 %v1897_v14, %v946_v17 }
 0x13e   :  { %2327 = vst [vmem:[#allocation17_spill] sm:$0xff] %v1989_v31 }
 0x13f   :  { %1215 = vmatpush.msrb.mxu0 %v1082_v30  ;;  %v945_v30 = vmul.f32 0.2, %v1889_v9 }
 0x141   :  { %1216 = vmatpush.msrb.mxu0 %v1081_v42  ;;  %v1075_v42 = vmax.f32 %v1903_v21, %v947_v6  ;;  %v1073_v10 = vmax.f32 %v1889_v9, %v945_v30  ;;  %v1070_v9 = vmax.f32 %v1865_v54, %v942_v3  ;;  %v939_v6 = vmul.f32 0.2, %v1849_v41 }
 0x142   :  { %v1967_v43 = vpop.f32.mrf.mxu0  ;;  %v1969_v46 = vpop.f32.mrf.mxu1 }
 0x143   :  { %1217 = vmatpush.msrb.mxu0 %v1080_v37  ;;  %v943_v37 = vmul.f32 0.2, %v1873_v61  ;;  %v1067_v30 = vmax.f32 %v1849_v41, %v939_v6 }
 0x145   :  { %1218 = vmatpush.msrb.mxu0 %v1079_v58  ;;  %v1686_v58 = vld [vmem:[#allocation3 + $0x88] sm:$0xff]  ;;  %v1071_v14 = vmax.f32 %v1873_v61, %v943_v37  ;;  %v2003_v15 = vpop.f32.mrf.mxu3  ;;  %v2005_v55 = vpop.f32.mrf.mxu2 }
 0x146   :  { %698 = vmatmul.bf16.gmra.mxu0 %v1685_v47  ;;  %v1072_v47 = vmax.f32 %v1881_v2, %v944_v26  ;;  %2328 = vst [vmem:[#allocation18_spill] sm:$0xff] %v2005_v55  ;;  %v940_v2 = vmul.f32 0.2, %v1853_v44 }
 0x147   :  { %1219 = vmatpush.msrb.mxu0 %v1078_v63  ;;  %v941_v63 = vmul.f32 0.2, %v1857_v49 }
 0x149   :  { %1220 = vmatpush.msrb.mxu0 %v1077_v7  ;;  %v1069_v7 = vmax.f32 %v1857_v49, %v941_v63 }
 0x14a   :  { %v1983_v29 = vpop.f32.mrf.mxu0  ;;  %v1985_v39 = vpop.f32.mrf.mxu1 }
 0x14b   :  { %1221 = vmatpush.msrb.mxu0 %v1076_v45  ;;  %v1068_v45 = vmax.f32 %v1853_v44, %v940_v2 }
 0x14d   :  { %1222 = vmatpush.msrb.mxu0 %v1075_v42  ;;  %v2017_v42 = vpop.f32.mrf.mxu2  ;;  %v2019_v54 = vpop.f32.mrf.mxu3 }
 0x14e   :  { %2329 = vst [vmem:[#allocation19_spill] sm:$0xff] %v2017_v42 }
 0x14f   :  { %1223 = vmatpush.msrb.mxu0 %v1074_v33  ;;  %2330 = vst [vmem:[#allocation20_spill] sm:$0xff] %v2019_v54 }
 0x151   :  { %1224 = vmatpush.msrb.mxu0 %v1073_v10 }
 0x152   :  { %v1997_v51 = vpop.f32.mrf.mxu0  ;;  %v1999_v21 = vpop.f32.mrf.mxu1 }
 0x153   :  { %1225 = vmatpush.msrb.mxu0 %v1072_v47 }
 0x155   :  { %1226 = vmatpush.msrb.mxu0 %v1071_v14  ;;  %v2023_v37 = vpop.f32.mrf.mxu2  ;;  %v2025_v49 = vpop.f32.mrf.mxu3 }
 0x156   :  { %703 = vmatmul.bf16.gmra.mxu0 %v1686_v58  ;;  %2331 = vst [vmem:[#allocation21_spill] sm:$0xff] %v2023_v37 }
 0x157   :  { %1227 = vmatpush.msrb.mxu0 %v1070_v9  ;;  %2332 = vst [vmem:[#allocation22_spill] sm:$0xff] %v2025_v49 }
 0x159   :  { %1228 = vmatpush.msrb.mxu0 %v1069_v7 }
 0x15a   :  { %v2012_v17 = vpop.f32.mrf.mxu0  ;;  %v2014_v61 = vpop.f32.mrf.mxu1 }
 0x15b   :  { %1229 = vmatpush.msrb.mxu0 %v1068_v45 }
 0x15d   :  { %1230 = vmatpush.msrb.mxu0 %v1067_v30  ;;  %v2029_v47 = vpop.f32.mrf.mxu2  ;;  %v2031_v3 = vpop.f32.mrf.mxu3 }
 0x15e   :  { %2333 = vst [vmem:[#allocation23_spill] sm:$0xff] %v2029_v47 }
 0x15f   :  { %2334 = vst [vmem:[#allocation24_spill] sm:$0xff] %v2031_v3 }
 0x162   :  { %v2021_v33 = vpop.f32.mrf.mxu0  ;;  %v759_v26 = vpop.f32.mrf.mxu1 }
 0x163   :  { %v995_v40 = vmul.f32 0.2, %v759_v26 }
 0x165   :  { %v2035_v63 = vpop.f32.mrf.mxu2  ;;  %v2039_v2 = vpop.f32.mrf.mxu3 }
 0x166   :  { %2335 = vst [vmem:[#allocation25_spill] sm:$0xff] %v2035_v63 }
 0x167   :  { %2336 = vst [vmem:[#allocation26_spill] sm:$0xff] %v2039_v2 }
 0x16a   :  { %v2027_v44 = vpop.f32.mrf.mxu0  ;;  %v761_v10 = vpop.f32.mrf.mxu1 }
 0x16b   :  { %v996_v38 = vmul.f32 0.2, %v761_v10 }
 0x16d   :  { %v2041_v6 = vpop.f32.mrf.mxu2  ;;  %v2045_v30 = vpop.f32.mrf.mxu3 }
 0x16e   :  { %2337 = vst [vmem:[#allocation27_spill] sm:$0xff] %v2041_v6 }
 0x16f   :  { %2338 = vst [vmem:[#allocation28_spill] sm:$0xff] %v2045_v30 }
 0x172   :  { %v2033_v41 = vpop.f32.mrf.mxu0  ;;  %v764_v58 = vpop.f32.mrf.mxu1 }
 0x173   :  { %v997_v20 = vmul.f32 0.2, %v764_v58 }
 0x175   :  { %v2049_v3 = vpop.f32.mrf.mxu2  ;;  %v2051_v31 = vpop.f32.mrf.mxu3  ;;  %v1125_v11 = vmax.f32 %v764_v58, %v997_v20  ;;  %v991_v20 = vmul.f32 0.2, %v1969_v46 }
 0x176   :  { %2339 = vst [vmem:[#allocation29_spill] sm:$0xff] %v2049_v3 }
 0x177   :  { %2340 = vst [vmem:[#allocation30_spill] sm:$0xff] %v2051_v31 }
 0x17a   :  { %v2037_v14 = vpop.f32.mrf.mxu0  ;;  %v766_v9 = vpop.f32.mrf.mxu1 }
 0x17b   :  { %v998_v13 = vmul.f32 0.2, %v766_v9 }
 0x17d   :  { %v2055_v37 = vpop.f32.mrf.mxu2  ;;  %v2057_v47 = vpop.f32.mrf.mxu3 }
 0x17e   :  { %2341 = vst [vmem:[#allocation31_spill] sm:$0xff] %v2055_v37 }
 0x17f   :  { %2342 = vst [vmem:[#allocation32_spill] sm:$0xff] %v2057_v47  ;;  %v1126_v47 = vmax.f32 %v766_v9, %v998_v13  ;;  %v992_v13 = vmul.f32 0.2, %v1985_v39 }
 0x182   :  { %v2043_v7 = vpop.f32.mrf.mxu0  ;;  %v769_v45 = vpop.f32.mrf.mxu1 }
 0x183   :  { %v999_v60 = vmul.f32 0.2, %v769_v45 }
 0x185   :  { %v2061_v31 = vpop.f32.mrf.mxu2  ;;  %v1127_v25 = vmax.f32 %v769_v45, %v999_v60  ;;  %v2065_v32 = vpop.f32.mrf.mxu3  ;;  %v993_v60 = vmul.f32 0.2, %v1999_v21 }
 0x18a   :  { %v2047_v54 = vpop.f32.mrf.mxu0  ;;  %v771_v49 = vpop.f32.mrf.mxu1 }
 0x18b   :  { %v1000_v53 = vmul.f32 0.2, %v771_v49 }
 0x18d   :  { %v1128_v3 = vmax.f32 %v771_v49, %v1000_v53  ;;  %v1124_v53 = vmax.f32 %v761_v10, %v996_v38  ;;  %v2068_v49 = vpop.f32.mrf.mxu2  ;;  %v990_v38 = vmul.f32 0.2, %v1959_v19  ;;  %v1120_v10 = vmax.f32 %v1985_v39, %v992_v13 }
 0x18e   :  { %v1050_v39 = vmul.f32 0.2, %v2003_v15 }
 0x18f   :  { %v1118_v9 = vmax.f32 %v1959_v19, %v990_v38 }
 0x192   :  { %v2053_v55 = vpop.f32.mrf.mxu0  ;;  %v774_v42 = vpop.f32.mrf.mxu1 }
 0x193   :  { %v1001_v2 = vmul.f32 0.2, %v774_v42 }
 0x195   :  { %v1129_v8 = vmax.f32 %v774_v42, %v1001_v2  ;;  %v994_v42 = vmul.f32 0.2, %v2014_v61  ;;  %v2081_v58 = vpop.f32.mrf.mxu2 }
 0x19a   :  { %v2059_v63 = vpop.f32.mrf.mxu0  ;;  %v776_v6 = vpop.f32.mrf.mxu1 }
 0x19b   :  { %v1002_v30 = vmul.f32 0.2, %v776_v6 }
 0x19d   :  { %v1130_v1 = vmax.f32 %v776_v6, %v1002_v30 }
 0x19f   :  { %1275 = vmatpush.msrb.mxu1 %v1130_v1 }
 0x1a1   :  { %1276 = vmatpush.msrb.mxu1 %v1129_v8  ;;  %v1123_v8 = vmax.f32 %v759_v26, %v995_v40  ;;  %v989_v40 = vmul.f32 0.2, %v1952_v62  ;;  %v1119_v26 = vmax.f32 %v1969_v46, %v991_v20  ;;  %v1049_v46 = vmul.f32 0.2, %v1981_v23 }
 0x1a2   :  { %v2063_v37 = vpop.f32.mrf.mxu0 }
 0x1a3   :  { %1277 = vmatpush.msrb.mxu1 %v1128_v3  ;;  %v1122_v3 = vmax.f32 %v2014_v61, %v994_v42  ;;  %v988_v61 = vmul.f32 0.2, %v1939_v35  ;;  %v1117_v2 = vmax.f32 %v1952_v62, %v989_v40  ;;  %v1177_v20 = vmax.f32 %v1981_v23, %v1049_v46 }
 0x1a4   :  { %v963_v46 = vmul.f32 0.2, %v2043_v7 }
 0x1a5   :  { %1278 = vmatpush.msrb.mxu1 %v1127_v25  ;;  %v2073_v25 = vpop.f32.mrf.mxu3  ;;  %v1116_v45 = vmax.f32 %v1939_v35, %v988_v61  ;;  %v2097_v35 = vpop.f32.mrf.mxu2 }
 0x1a7   :  { %1279 = vmatpush.msrb.mxu1 %v1126_v47 }
 0x1a9   :  { %1280 = vmatpush.msrb.mxu1 %v1125_v11  ;;  %v1121_v11 = vmax.f32 %v1999_v21, %v993_v60  ;;  %v987_v21 = vmul.f32 0.2, %v1930_v18  ;;  %v1048_v60 = vmul.f32 0.2, %v1964_v34 }
 0x1aa   :  { %v691_v1 = vpop.f32.mrf.mxu0 }
 0x1ab   :  { %1281 = vmatpush.msrb.mxu1 %v1124_v53  ;;  %v1115_v19 = vmax.f32 %v1930_v18, %v987_v21  ;;  %v968_v62 = vmul.f32 0.2, %v691_v1  ;;  %v1046_v18 = vmul.f32 0.2, %v1949_v48 }
 0x1ad   :  { %1282 = vmatpush.msrb.mxu1 %v1123_v8  ;;  %v2088_v6 = vpop.f32.mrf.mxu3  ;;  %v1178_v8 = vmax.f32 %v2003_v15, %v1050_v39  ;;  %v966_v15 = vmul.f32 0.2, %v2059_v63  ;;  %v1096_v40 = vmax.f32 %v691_v1, %v968_v62  ;;  %v964_v1 = vmul.f32 0.2, %v2047_v54 }
 0x1ae   :  { %v1043_v39 = vmul.f32 0.2, %v1917_v36 }
 0x1af   :  { %1283 = vmatpush.msrb.mxu1 %v1122_v3  ;;  %v1047_v3 = vmul.f32 0.2, %v1957_v50 }
 0x1b1   :  { %1284 = vmatpush.msrb.mxu1 %v1121_v11  ;;  %v967_v11 = vmul.f32 0.2, %v2063_v37  ;;  %v1175_v23 = vmax.f32 %v1957_v50, %v1047_v3  ;;  %v1094_v50 = vmax.f32 %v2059_v63, %v966_v15  ;;  %v1092_v63 = vmax.f32 %v2047_v54, %v964_v1 }
 0x1b2   :  { %v694_v47 = vpop.f32.mrf.mxu0  ;;  %v960_v54 = vmul.f32 0.2, %v2027_v44  ;;  %v1039_v3 = vmul.f32 0.2, %v1893_v12  ;;  %v1018_v1 = vmul.f32 0.2, %v1973_v59 }
 0x1b3   :  { %1285 = vmatpush.msrb.mxu1 %v1120_v10  ;;  %v969_v42 = vmul.f32 0.2, %v694_v47  ;;  %v1176_v10 = vmax.f32 %v1964_v34, %v1048_v60  ;;  %v1044_v34 = vmul.f32 0.2, %v1923_v57  ;;  %v961_v60 = vmul.f32 0.2, %v2033_v41 }
 0x1b5   :  { %1286 = vmatpush.msrb.mxu1 %v1119_v26  ;;  %v1097_v38 = vmax.f32 %v694_v47, %v969_v42  ;;  %v1045_v26 = vmul.f32 0.2, %v1934_v22  ;;  %v2105_v61 = vpop.f32.mrf.mxu3  ;;  %v1095_v47 = vmax.f32 %v2063_v37, %v967_v11  ;;  %v2121_v42 = vpop.f32.mrf.mxu2  ;;  %v1089_v11 = vmax.f32 %v2033_v41, %v961_v60 }
 0x1b7   :  { %1287 = vmatpush.msrb.mxu1 %v1118_v9  ;;  %v965_v9 = vmul.f32 0.2, %v2053_v55 }
 0x1b9   :  { %1288 = vmatpush.msrb.mxu1 %v1117_v2  ;;  %v1174_v2 = vmax.f32 %v1949_v48, %v1046_v18  ;;  %v1093_v37 = vmax.f32 %v2053_v55, %v965_v9  ;;  %v1172_v48 = vmax.f32 %v1923_v57, %v1044_v34  ;;  %v1091_v55 = vmax.f32 %v2043_v7, %v963_v46 }
 0x1ba   :  { %v696_v30 = vpop.f32.mrf.mxu0  ;;  %v1040_v57 = vmul.f32 0.2, %v1899_v16  ;;  %v959_v7 = vmul.f32 0.2, %v2021_v33  ;;  %v958_v18 = vmul.f32 0.2, %v2012_v17 }
 0x1bb   :  { %v970_v53 = vmul.f32 0.2, %v696_v30  ;;  %1289 = vmatpush.msrb.mxu1 %v1116_v45  ;;  %v1173_v45 = vmax.f32 %v1934_v22, %v1045_v26  ;;  %v1041_v22 = vmul.f32 0.2, %v1905_v24 }
 0x1bc   :  { %v1087_v41 = vmax.f32 %v2021_v33, %v959_v7  ;;  %v1086_v9 = vmax.f32 %v2012_v17, %v958_v18  ;;  %v955_v33 = vmul.f32 0.2, %v1967_v43 }
 0x1bd   :  { %1290 = vmatpush.msrb.mxu1 %v1115_v19  ;;  %v1098_v13 = vmax.f32 %v696_v30, %v970_v53  ;;  %v1042_v30 = vmul.f32 0.2, %v1911_v28  ;;  %v962_v53 = vmul.f32 0.2, %v2037_v14  ;;  %v1171_v19 = vmax.f32 %v1917_v36, %v1043_v39  ;;  %v2147_v15 = vpop.f32.mrf.mxu2 }
 0x1be   :  { %v1017_v39 = vmul.f32 0.2, %v1961_v27 }
 0x1bf   :  { %1335 = vmatpush.msra.mxu1 %v1178_v8  ;;  %1235 = vmatpush.msrb.mxu2 %v1098_v13  ;;  %v1170_v62 = vmax.f32 %v1911_v28, %v1042_v30  ;;  %v2133_v13 = vpop.f32.mrf.mxu3  ;;  %v1090_v36 = vmax.f32 %v2037_v14, %v962_v53  ;;  %v1038_v28 = vmul.f32 0.2, %v1885_v4  ;;  %v1088_v14 = vmax.f32 %v2027_v44, %v960_v54  ;;  %v2343_v53 = vld [vmem:[#allocation16_spill] sm:$0xff] }
 0x1c0   :  { %v956_v44 = vmul.f32 0.2, %v1983_v29 }
 0x1c1   :  { %1336 = vmatpush.msra.mxu1 %v1177_v20  ;;  %1236 = vmatpush.msrb.mxu2 %v1097_v38  ;;  %v1169_v20 = vmax.f32 %v1905_v24, %v1041_v22  ;;  %v1168_v38 = vmax.f32 %v1899_v16, %v1040_v57  ;;  %v1167_v24 = vmax.f32 %v1893_v12, %v1039_v3  ;;  %v1036_v16 = vmul.f32 0.2, %v1869_v56  ;;  %v2345_v3 = vld [vmem:[#allocation14_spill] sm:$0xff] }
 0x1c2   :  { %v1035_v12 = vmul.f32 0.2, %v1861_v52  ;;  %v1084_v17 = vmax.f32 %v1983_v29, %v956_v44  ;;  %v1146_v29 = vmax.f32 %v1973_v59, %v1018_v1  ;;  %v2198_v44 = vpop.f32.mrf.mxu1 }
 0x1c3   :  { %1337 = vmatpush.msra.mxu1 %v1176_v10  ;;  %1237 = vmatpush.msrb.mxu2 %v1096_v40  ;;  %v2109_v21 = vpop.f32.mrf.mxu0  ;;  %v1037_v10 = vmul.f32 0.2, %v1877_v0  ;;  %v957_v40 = vmul.f32 0.2, %v1997_v51 }
 0x1c4   :  { %v971_v59 = vmul.f32 0.2, %v2109_v21 }
 0x1c5   :  { %1338 = vmatpush.msra.mxu1 %v1175_v23  ;;  %1238 = vmatpush.msrb.mxu2 %v1095_v47  ;;  %v1166_v23 = vmax.f32 %v1885_v4, %v1038_v28  ;;  %v1165_v47 = vmax.f32 %v1877_v0, %v1037_v10  ;;  %v1164_v4 = vmax.f32 %v1869_v56, %v1036_v16  ;;  %v2167_v0 = vld [vmem:[%s2286_s2] sm:$0xff]  ;;  %v2346_v28 = vld [vmem:[#allocation13_spill] sm:$0xff] }
 0x1c6   :  { %v1083_v56 = vmax.f32 %v1967_v43, %v955_v33  ;;  %v1200_v46 = vperm.slane %v2167_v0, 1  ;;  %v1201_v10 = vperm.slane %v2167_v0, 2  ;;  %v2349_v33 = vld [vmem:[#allocation10_spill] sm:$0xff] }
 0x1c7   :  { %1339 = vmatpush.msra.mxu1 %v1174_v2  ;;  %1239 = vmatpush.msrb.mxu2 %v1094_v50  ;;  %v2157_v34 = vpop.f32.mrf.mxu3  ;;  %v1085_v2 = vmax.f32 %v1997_v51, %v957_v40  ;;  %v1163_v50 = vmax.f32 %v1861_v52, %v1035_v12  ;;  %v1145_v52 = vmax.f32 %v1961_v27, %v1017_v39  ;;  %v1033_v27 = vmul.f32 0.2, %v2147_v15  ;;  %v2350_v39 = vld [vmem:[#allocation9_spill] sm:$0xff] }
 0x1c8   :  { %v1032_v40 = vmul.f32 0.2, %v2121_v42 }
 0x1c9   :  { %1340 = vmatpush.msra.mxu1 %v1173_v45  ;;  %1240 = vmatpush.msrb.mxu2 %v1093_v37  ;;  %v1016_v37 = vmul.f32 0.2, %v1955_v5 }
 0x1cb   :  { %1341 = vmatpush.msra.mxu1 %v1172_v48  ;;  %1241 = vmatpush.msrb.mxu2 %v1092_v63  ;;  %v2129_v8 = vpop.f32.mrf.mxu0  ;;  %v856_v48 = vpop.f32.mrf.mxu2  ;;  %v1015_v63 = vmul.f32 0.2, %v2343_v53 }
 0x1cc   :  { %v972_v22 = vmul.f32 0.2, %v2129_v8  ;;  %v1034_v60 = vmul.f32 0.2, %v856_v48 }
 0x1cd   :  { %1342 = vmatpush.msra.mxu1 %v1171_v19  ;;  %1242 = vmatpush.msrb.mxu2 %v1091_v55  ;;  %v2344_v55 = vld [vmem:[#allocation15_spill] sm:$0xff]  ;;  %v1143_v7 = vmax.f32 %v2343_v53, %v1015_v63 }
 0x1ce   :  { %v1014_v57 = vmul.f32 0.2, %v2344_v55  ;;  %v2353_v63 = vld [vmem:[#allocation7_spill] sm:$0xff] }
 0x1cf   :  { %1343 = vmatpush.msra.mxu1 %v1170_v62  ;;  %1243 = vmatpush.msrb.mxu2 %v1090_v36  ;;  %v1144_v62 = vmax.f32 %v1955_v5, %v1016_v37  ;;  %v2181_v54 = vpop.f32.mrf.mxu3  ;;  %v1199_v36 = vperm.slane %v2167_v0, 0  ;;  %v1012_v5 = vmul.f32 0.2, %v2346_v28  ;;  %v2351_v37 = vld [vmem:[#allocation8_spill] sm:$0xff] }
 0x1d0   :  { %v1142_v18 = vmax.f32 %v2344_v55, %v1014_v57  ;;  %v2355_v55 = vld [vmem:[#allocation6_spill] sm:$0xff] }
 0x1d1   :  { %1344 = vmatpush.msra.mxu1 %v1169_v20  ;;  %1244 = vmatpush.msrb.mxu2 %v1089_v11  ;;  %v1013_v20 = vmul.f32 0.2, %v2345_v3  ;;  %v1100_v11 = vmax.f32 %v2129_v8, %v972_v22  ;;  %v1140_v12 = vmax.f32 %v2346_v28, %v1012_v5  ;;  %v1005_v57 = vmul.f32 0.2, %v2355_v55 }
 0x1d2   :  { %1231 = vmatmul.f32.vlgmr.msrb.gmra.mxu0 %v1199_v36  ;;  %v1003_v5 = vmul.f32 0.2, %v2198_v44 }
 0x1d3   :  { %1345 = vmatpush.msra.mxu1 %v1168_v38  ;;  %1245 = vmatpush.msrb.mxu2 %v1088_v14  ;;  %v704_v26 = vpop.f32.mrf.mxu0  ;;  %v1162_v38 = vmax.f32 %v856_v48, %v1034_v60  ;;  %v1099_v14 = vmax.f32 %v2109_v21, %v971_v59  ;;  %v1141_v16 = vmax.f32 %v2345_v3, %v1013_v20  ;;  %v2348_v21 = vld [vmem:[#allocation11_spill] sm:$0xff]  ;;  %v781_v60 = vpop.f32.mrf.mxu1 }
 0x1d4   :  { %v973_v45 = vmul.f32 0.2, %v704_v26  ;;  %v2352_v48 = vld [vmem:[#allocation31_spill] sm:$0xff]  ;;  %v1004_v3 = vmul.f32 0.2, %v781_v60  ;;  %v1133_v28 = vmax.f32 %v2355_v55, %v1005_v57  ;;  %v2366_v55 = vld [vmem:[#allocation26_spill] sm:$0xff] }
 0x1d5   :  { %1346 = vmatpush.msra.mxu1 %v1167_v24  ;;  %1246 = vmatpush.msrb.mxu2 %v1087_v41  ;;  %v1202_v24 = vperm.slane %v2167_v0, 3  ;;  %v1161_v41 = vmax.f32 %v2147_v15, %v1033_v27  ;;  %v1030_v15 = vmul.f32 0.2, %v2081_v58  ;;  %v2356_v59 = vld [vmem:[#allocation27_spill] sm:$0xff]  ;;  %v1054_v57 = vmul.f32 0.2, %v2366_v55 }
 0x1d6   :  { %v1101_v43 = vmax.f32 %v704_v26, %v973_v45  ;;  %v2347_v26 = vld [vmem:[#allocation12_spill] sm:$0xff]  ;;  %v1008_v45 = vmul.f32 0.2, %v2350_v39 }
 0x1d7   :  { %1347 = vmatpush.msra.mxu1 %v1166_v23  ;;  %1247 = vmatpush.msrb.mxu2 %v1086_v9  ;;  %v1011_v8 = vmul.f32 0.2, %v2347_v26  ;;  %v1031_v23 = vmul.f32 0.2, %v2097_v35  ;;  %v1010_v9 = vmul.f32 0.2, %v2348_v21  ;;  %v2206_v1 = vpop.f32.mrf.mxu3 }
 0x1d8   :  { %1291 = vmatmul.f32.vlgmr.msrb.gmra.mxu1 %v1202_v24  ;;  %v1136_v22 = vmax.f32 %v2350_v39, %v1008_v45  ;;  %v1132_v24 = vmax.f32 %v781_v60, %v1004_v3 }
 0x1d9   :  { %1348 = vmatpush.msra.mxu1 %v1165_v47  ;;  %1248 = vmatpush.msrb.mxu2 %v1085_v2  ;;  %v1160_v47 = vmax.f32 %v2121_v42, %v1032_v40  ;;  %v1009_v2 = vmul.f32 0.2, %v2349_v33  ;;  %v1205_v42 = vperm.slane %v2167_v0, 6  ;;  %v2359_v40 = vld [vmem:[#allocation21_spill] sm:$0xff] }
 0x1db   :  { %1349 = vmatpush.msra.mxu1 %v1164_v4  ;;  %1249 = vmatpush.msrb.mxu2 %v1084_v17  ;;  %v706_v51 = vpop.f32.mrf.mxu0  ;;  %v1139_v4 = vmax.f32 %v2347_v26, %v1011_v8  ;;  %v1029_v17 = vmul.f32 0.2, %v2068_v49  ;;  %v1065_v8 = vmul.f32 0.2, %v2206_v1 }
 0x1dc   :  { %v974_v30 = vmul.f32 0.2, %v706_v51 }
 0x1dd   :  { %1350 = vmatpush.msra.mxu1 %v1163_v50  ;;  %1250 = vmatpush.msrb.mxu2 %v1083_v56  ;;  %v1159_v50 = vmax.f32 %v2097_v35, %v1031_v23  ;;  %v1138_v56 = vmax.f32 %v2348_v21, %v1010_v9  ;;  %v1027_v35 = vmul.f32 0.2, %v2352_v48  ;;  %v1157_v53 = vmax.f32 %v2068_v49, %v1029_v17  ;;  %v2360_v21 = vld [vmem:[#allocation19_spill] sm:$0xff] }
 0x1de   :  { %v1102_v19 = vmax.f32 %v706_v51, %v974_v30  ;;  %1251 = vmatmul.f32.vlgmr.msrb.gmra.mxu2 %v1200_v46  ;;  %v1028_v51 = vmul.f32 0.2, %v2061_v31  ;;  %v1158_v46 = vmax.f32 %v2081_v58, %v1030_v15  ;;  %v1137_v30 = vmax.f32 %v2349_v33, %v1009_v2  ;;  %v2361_v33 = vld [vmem:[#allocation18_spill] sm:$0xff] }
 0x1df   :  { %1295 = vmatpush.msra.mxu2 %v1146_v29  ;;  %v1007_v29 = vmul.f32 0.2, %v2351_v37  ;;  %v1025_v49 = vmul.f32 0.2, %v2356_v59  ;;  %v1155_v36 = vmax.f32 %v2352_v48, %v1027_v35  ;;  %v936_v20 = vpop.f32.mrf.mxu3  ;;  %v1203_v23 = vperm.slane %v2167_v0, 4 }
 0x1e0   :  { %1267 = vmatpush.msrb.mxu3 %v1102_v19  ;;  %1351 = vmatmul.f32.vlgmr.msra.gmra.mxu1 %v1205_v42  ;;  %v2354_v19 = vld [vmem:[#allocation29_spill] sm:$0xff]  ;;  %v1156_v58 = vmax.f32 %v2061_v31, %v1028_v51  ;;  %v1021_v9 = vmul.f32 0.2, %v2360_v21  ;;  %v1064_v15 = vmul.f32 0.2, %v2181_v54 }
 0x1e1   :  { %1296 = vmatpush.msra.mxu2 %v1145_v52  ;;  %v1006_v52 = vmul.f32 0.2, %v2353_v63  ;;  %v1020_v2 = vmul.f32 0.2, %v2361_v33  ;;  %v1063_v17 = vmul.f32 0.2, %v2157_v34 }
 0x1e2   :  { %1268 = vmatpush.msrb.mxu3 %v1101_v43  ;;  %v1026_v43 = vmul.f32 0.2, %v2354_v19  ;;  %v1149_v45 = vmax.f32 %v2360_v21, %v1021_v9  ;;  %v1192_v42 = vmax.f32 %v2181_v54, %v1064_v15  ;;  %v1059_v54 = vmul.f32 0.2, %v2073_v25 }
 0x1e3   :  { %1297 = vmatpush.msra.mxu2 %v1144_v62  ;;  %v1135_v62 = vmax.f32 %v2351_v37, %v1007_v29  ;;  %v1134_v27 = vmax.f32 %v2353_v63, %v1006_v52  ;;  %v1148_v51 = vmax.f32 %v2361_v33, %v1020_v2  ;;  %v1191_v37 = vmax.f32 %v2157_v34, %v1063_v17  ;;  %v2363_v63 = vld [vmem:[#allocation32_spill] sm:$0xff] }
 0x1e4   :  { %1269 = vmatpush.msrb.mxu3 %v1100_v11  ;;  %v1154_v31 = vmax.f32 %v2354_v19, %v1026_v43  ;;  %v1058_v34 = vmul.f32 0.2, %v2065_v32  ;;  %v1057_v52 = vmul.f32 0.2, %v2363_v63 }
 0x1e5   :  { %1298 = vmatpush.msra.mxu2 %v1143_v7  ;;  %v2357_v7 = vld [vmem:[#allocation25_spill] sm:$0xff] }
 0x1e6   :  { %1270 = vmatpush.msrb.mxu3 %v1099_v14  ;;  %v1024_v11 = vmul.f32 0.2, %v2357_v7  ;;  %v1153_v14 = vmax.f32 %v2356_v59, %v1025_v49  ;;  %v1186_v43 = vmax.f32 %v2065_v32, %v1058_v34  ;;  %v1185_v60 = vmax.f32 %v2363_v63, %v1057_v52  ;;  %v2368_v49 = vld [vmem:[#allocation22_spill] sm:$0xff] }
 0x1e7   :  { %1299 = vmatpush.msra.mxu2 %v1142_v18  ;;  %1271 = vmatmul.f32.vlgmr.msrb.gmra.mxu3 %v1201_v10  ;;  %v1066_v10 = vmul.f32 0.2, %v936_v20  ;;  %v1182_v32 = vmax.f32 %v2366_v55, %v1054_v57 }
 0x1e8   :  { %1315 = vmatpush.msra.mxu3 %v1162_v38  ;;  %v2358_v38 = vld [vmem:[#allocation23_spill] sm:$0xff]  ;;  %v1152_v26 = vmax.f32 %v2357_v7, %v1024_v11  ;;  %v1206_v11 = vperm.slane %v2167_v0, 7 }
 0x1e9   :  { %1300 = vmatpush.msra.mxu2 %v1141_v16  ;;  %v1023_v18 = vmul.f32 0.2, %v2358_v38  ;;  %v1131_v16 = vmax.f32 %v2198_v44, %v1003_v5  ;;  %v1193_v44 = vmax.f32 %v2206_v1, %v1065_v8  ;;  %v1204_v1 = vperm.slane %v2167_v0, 5 }
 0x1ea   :  { %1316 = vmatpush.msra.mxu3 %v1161_v41  ;;  %v1022_v41 = vmul.f32 0.2, %v2359_v40 }
 0x1eb   :  { %1301 = vmatpush.msra.mxu2 %v1140_v12  ;;  %v1151_v12 = vmax.f32 %v2358_v38, %v1023_v18 }
 0x1ec   :  { %1317 = vmatpush.msra.mxu3 %v1160_v47  ;;  %v1194_v47 = vmax.f32 %v936_v20, %v1066_v10 }
 0x1ed   :  { %1302 = vmatpush.msra.mxu2 %v1139_v4  ;;  %v1150_v4 = vmax.f32 %v2359_v40, %v1022_v41 }
 0x1ee   :  { %1318 = vmatpush.msra.mxu3 %v1159_v50  ;;  %v2362_v50 = vld [vmem:[#allocation17_spill] sm:$0xff] }
 0x1ef   :  { %1303 = vmatpush.msra.mxu2 %v1138_v56  ;;  %v1019_v39 = vmul.f32 0.2, %v2362_v50  ;;  %v1062_v56 = vmul.f32 0.2, %v2133_v13 }
 0x1f0   :  { %1319 = vmatpush.msra.mxu3 %v1158_v46  ;;  %v1061_v46 = vmul.f32 0.2, %v2105_v61 }
 0x1f1   :  { %1304 = vmatpush.msra.mxu2 %v1137_v30  ;;  %v1147_v29 = vmax.f32 %v2362_v50, %v1019_v39  ;;  %v1060_v30 = vmul.f32 0.2, %v2088_v6  ;;  %v1190_v48 = vmax.f32 %v2133_v13, %v1062_v56  ;;  %v2364_v13 = vld [vmem:[#allocation30_spill] sm:$0xff] }
 0x1f2   :  { %1320 = vmatpush.msra.mxu3 %v1157_v53  ;;  %v1189_v35 = vmax.f32 %v2105_v61, %v1061_v46  ;;  %v1056_v19 = vmul.f32 0.2, %v2364_v13 }
 0x1f3   :  { %1305 = vmatpush.msra.mxu2 %v1136_v22  ;;  %v1188_v53 = vmax.f32 %v2088_v6, %v1060_v30  ;;  %v1187_v22 = vmax.f32 %v2073_v25, %v1059_v54 }
 0x1f4   :  { %1321 = vmatpush.msra.mxu3 %v1156_v58  ;;  %v2365_v58 = vld [vmem:[#allocation28_spill] sm:$0xff]  ;;  %v1184_v6 = vmax.f32 %v2364_v13, %v1056_v19 }
 0x1f5   :  { %1306 = vmatpush.msra.mxu2 %v1135_v62  ;;  %v1055_v61 = vmul.f32 0.2, %v2365_v58  ;;  %v2367_v62 = vld [vmem:[#allocation24_spill] sm:$0xff] }
 0x1f6   :  { %1322 = vmatpush.msra.mxu3 %v1155_v36  ;;  %v1053_v59 = vmul.f32 0.2, %v2367_v62  ;;  %v1052_v36 = vmul.f32 0.2, %v2368_v49 }
 0x1f7   :  { %1307 = vmatpush.msra.mxu2 %v1134_v27  ;;  %v1183_v25 = vmax.f32 %v2365_v58, %v1055_v61  ;;  %v2369_v27 = vld [vmem:[#allocation20_spill] sm:$0xff] }
 0x1f8   :  { %1323 = vmatpush.msra.mxu3 %v1154_v31  ;;  %v1051_v3 = vmul.f32 0.2, %v2369_v27  ;;  %v1181_v20 = vmax.f32 %v2367_v62, %v1053_v59  ;;  %v1180_v7 = vmax.f32 %v2368_v49, %v1052_v36 }
 0x1f9   :  { %1308 = vmatpush.msra.mxu2 %v1133_v28  ;;  %v1197_v28 = vstv %s2287_s3 }
 0x1fa   :  { %1324 = vmatpush.msra.mxu3 %v1153_v14  ;;  %v1179_v31 = vmax.f32 %v2369_v27, %v1051_v3 }
 0x1fb   :  { %1309 = vmatpush.msra.mxu2 %v1132_v24 }
 0x1fc   :  { %1325 = vmatpush.msra.mxu3 %v1152_v26 }
 0x1fd   :  { %1310 = vmatpush.msra.mxu2 %v1131_v16 }
 0x1fe   :  { %1326 = vmatpush.msra.mxu3 %v1151_v12  ;;  %1311 = vmatmul.f32.vlgmr.msra.gmra.mxu2 %v1203_v23 }
 0x1ff   :  { %1355 = vmatpush.msrb.mxu2 %v1194_v47 }
 0x200   :  { %1327 = vmatpush.msra.mxu3 %v1150_v4 }
 0x201   :  { %1356 = vmatpush.msrb.mxu2 %v1193_v44 }
 0x202   :  { %1328 = vmatpush.msra.mxu3 %v1149_v45 }
 0x203   :  { %1357 = vmatpush.msrb.mxu2 %v1192_v42 }
 0x204   :  { %1329 = vmatpush.msra.mxu3 %v1148_v51 }
 0x205   :  { %1358 = vmatpush.msrb.mxu2 %v1191_v37 }
 0x206   :  { %1330 = vmatpush.msra.mxu3 %v1147_v29 }
 0x207   :  { %1359 = vmatpush.msrb.mxu2 %v1190_v48  ;;  %1331 = vmatmul.f32.vlgmr.msra.gmra.mxu3 %v1204_v1 }
 0x209   :  { %1360 = vmatpush.msrb.mxu2 %v1189_v35 }
 0x20b   :  { %1361 = vmatpush.msrb.mxu2 %v1188_v53 }
 0x20d   :  { %1362 = vmatpush.msrb.mxu2 %v1187_v22 }
 0x20f   :  { %1363 = vmatpush.msrb.mxu2 %v1186_v43 }
 0x211   :  { %1364 = vmatpush.msrb.mxu2 %v1185_v60 }
 0x213   :  { %1365 = vmatpush.msrb.mxu2 %v1184_v6 }
 0x215   :  { %1366 = vmatpush.msrb.mxu2 %v1183_v25 }
 0x217   :  { %1367 = vmatpush.msrb.mxu2 %v1182_v32 }
 0x219   :  { %1368 = vmatpush.msrb.mxu2 %v1181_v20 }
 0x21b   :  { %1369 = vmatpush.msrb.mxu2 %v1180_v7 }
 0x21d   :  { %1370 = vmatpush.msrb.mxu2 %v1179_v31 }
 0x21e   :  { %1371 = vmatmul.f32.vlgmr.msrb.gmra.mxu2 %v1206_v11 }
 0x24f   :  { %v1232_v5 = vpop.f32.mrf.mxu0 }
 0x250   :  { %v1233_v38 = vadd.f32 %v1232_v5, %v1197_v28 }
 0x255   :  { %v1292_v40 = vpop.f32.mrf.mxu1 }
 0x25d   :  { %v1352_v23 = vpop.f32.mrf.mxu1 }
 0x261   :  { %v1252_v18 = vpop.f32.mrf.mxu2 }
 0x262   :  { %v1253_v14 = vadd.f32 %v1252_v18, %v1233_v38 }
 0x26a   :  { %v1272_v10 = vpop.f32.mrf.mxu3 }
 0x26b   :  { %v1273_v24 = vadd.f32 %v1272_v10, %v1253_v14 }
 0x26d   :  { %v1293_v41 = vadd.f32 %v1292_v40, %v1273_v24 }
 0x281   :  { %v1312_v26 = vpop.f32.mrf.mxu2 }
 0x282   :  { %v1313_v8 = vadd.f32 %v1312_v26, %v1293_v41 }
 0x28a   :  { %v1332_v0 = vpop.f32.mrf.mxu3 }
 0x28b   :  { %v1333_v16 = vadd.f32 %v1332_v0, %v1313_v8 }
 0x28d   :  { %v1353_v21 = vadd.f32 %v1352_v23, %v1333_v16 }
 0x2a1   :  { %v1372_v9 = vpop.f32.mrf.mxu2 }
 0x2a2   :  { %v1373_v12 = vadd.f32 %v1372_v9, %v1353_v21 }
 0x2a4   :  { %1375 = vst [vmem:[%s2288_s4] sm:$0x1] %v1373_v12 }
 0x2a5   :  { %1380 = vsyncpa [#allocation4], 1 }

</bundles_post_ra>
